<compile_context>
chip_gen: v7x
topology: tpu7x:2x2x1
jax: 0.10.0
libtpu: 0.0.40
codegen_flags: <defaults>
</compile_context>

<pallas_src>
import jax
import jax.numpy as jnp
from jax.experimental import pallas as pl
from jax.experimental.pallas import tpu as pltpu

_LANE = 128
_SUBLANE = 8
_MiB = 1024 * 1024

_SMALL_PADDED_BYTES = 2 * _MiB      # no-grid path: padded (in + out + scale) budget
_TILED_4BUF_BUDGET = 16 * _MiB      # tiled path: in+out blocks, double-buffered


def _round_up(x, m):
    return ((x + m - 1) // m) * m


def _round_down(x, m):
    return (x // m) * m


def _vmem_capacity_bytes():
    try:
        return int(pltpu.get_tpu_info().vmem_capacity_bytes)
    except Exception:
        return 64 * _MiB            # conservative fallback (v7x per-TC VMEM)


def _scale_mul_kernel(scale_ref, x_ref, o_ref):
    # scale_ref: (nc, 1)   x_ref / o_ref: (nc, t)
    # Casts happen here on the VPU (free slack in a mem-bound kernel) so the
    # wrapper never materializes a converted copy of the activation in HBM.
    o_ref[...] = x_ref[...].astype(o_ref.dtype) * scale_ref[...].astype(o_ref.dtype)


def channel_scale_mul(x84, x79, *, tile_hw=None):
    """x84: (1 or N, C, 1, 1) scale, x79: (N, C, H, W) -> (N, C, H, W).

    Matches torch broadcasting semantics of `x84 * x79` for these shapes.
    `tile_hw` (multiple of 128) forces the tiled path; mainly for testing.
    """
    N, C, H, W = x79.shape
    assert x84.ndim == 4 and x84.shape[1:] == (C, 1, 1)
    assert x84.shape[0] in (1, N)

    out_dtype = jnp.result_type(x84.dtype, x79.dtype)
    HW = H * W
    NC = N * C

    # (NC, HW) slab: channels on sublanes, flattened spatial on lanes.
    # NCHW is contiguous so these reshapes are layout-free; NO dtype casts here.
    x2d = x79.reshape(NC, HW)
    s2d = jnp.broadcast_to(x84.reshape(x84.shape[0], C), (N, C)).reshape(NC, 1)

    x_item = jnp.dtype(x2d.dtype).itemsize
    s_item = jnp.dtype(s2d.dtype).itemsize
    o_item = jnp.dtype(out_dtype).itemsize

    cost = pl.CostEstimate(
        flops=NC * HW,
        transcendentals=0,
        bytes_accessed=NC * HW * (x_item + o_item) + NC * s_item,
    )

    # Output buffer can only reuse the activation buffer when dtypes match.
    aliases = {1: 0} if x2d.dtype == jnp.dtype(out_dtype) else {}

    # Padded VMEM footprint of the no-grid path: both slabs resident + scale.
    nc_pad = _round_up(NC, _SUBLANE)
    hw_pad = _round_up(HW, _LANE)
    small_padded = nc_pad * hw_pad * (x_item + o_item) + nc_pad * _LANE * s_item

    if tile_hw is None and small_padded <= _SMALL_PADDED_BYTES:
        # Tiny case (this module's shape): whole slab resident in VMEM,
        # no grid machinery, single copy-in / copy-out.
        vmem = pl.BlockSpec(memory_space=pltpu.MemorySpace.VMEM)
        out2d = pl.pallas_call(
            _scale_mul_kernel,
            out_shape=jax.ShapeDtypeStruct((NC, HW), out_dtype),
            in_specs=[vmem, vmem],
            out_specs=vmem,
            input_output_aliases=aliases,
            cost_estimate=cost,
        )(s2d, x2d)
    else:
        # Tiled, lane-dense, double-buffered path.
        capacity = _vmem_capacity_bytes()
        budget = min(_TILED_4BUF_BUDGET, capacity // 4)
        blk_item = max(x_item, o_item)
        per_block = max(budget // 4, _SUBLANE * _LANE * blk_item)

        # Sublane (channel) tile: multiple of 8 rows, small enough that even a
        # minimum 128-lane block fits the per-block budget (guards huge NC).
        if NC % _SUBLANE != 0:
            tile_nc = NC                      # full-dim exemption
        else:
            tile_nc = min(NC, max(_SUBLANE,
                                  _round_down(per_block // (_LANE * blk_item), _SUBLANE)))

        if tile_hw is None:
            tile_hw = max(_LANE, _round_down(per_block // (tile_nc * blk_item), _LANE))
        else:
            assert tile_hw % _LANE == 0, "tile_hw must be a multiple of 128 lanes"
        tile_hw = min(tile_hw, HW)            # == HW uses the full-dim exemption

        # Guarantee >= 2 grid blocks so megacore (v7x) can shard the stream.
        if pl.cdiv(NC, tile_nc) * pl.cdiv(HW, tile_hw) < 2:
            if HW > _LANE:
                tile_hw = max(_LANE, _round_down(pl.cdiv(HW, 2), _LANE))
            elif NC > _SUBLANE and NC % _SUBLANE == 0:
                tile_nc = max(_SUBLANE, _round_down(pl.cdiv(NC, 2), _SUBLANE))

        grid = (pl.cdiv(NC, tile_nc), pl.cdiv(HW, tile_hw))
        out2d = pl.pallas_call(
            _scale_mul_kernel,
            out_shape=jax.ShapeDtypeStruct((NC, HW), out_dtype),
            grid=grid,
            in_specs=[
                pl.BlockSpec((tile_nc, 1), lambda i, j: (i, 0)),
                pl.BlockSpec((tile_nc, tile_hw), lambda i, j: (i, j)),
            ],
            out_specs=pl.BlockSpec((tile_nc, tile_hw), lambda i, j: (i, j)),
            input_output_aliases=aliases,
            cost_estimate=cost,
            compiler_params=pltpu.CompilerParams(
                dimension_semantics=("parallel", "parallel"),
                vmem_limit_bytes=min(32 * _MiB, capacity // 2),
            ),
        )(s2d, x2d)

    return out2d.reshape(N, C, H, W)


if __name__ == "__main__":
    key = jax.random.PRNGKey(0)
    k1, k2, k3, k4 = jax.random.split(key, 4)

    # Shapes implied by the module's forward (~0.45 MB activation).
    x79 = jax.random.normal(k1, (1, 144, 28, 28), dtype=jnp.float32)
    x84 = jax.random.normal(k2, (1, 144, 1, 1), dtype=jnp.float32)

    # Reference (== torch broadcasting), computed before the kernel since the
    # kernel may donate the (reshaped) activation buffer to the output.
    ref = x84 * x79

    # Path 1: whole slab in VMEM, no grid (module's actual shape).
    out = channel_scale_mul(x84, x79)
    jax.block_until_ready(out)
    assert out.shape == (1, 144, 28, 28)
    assert out.dtype == ref.dtype
    assert jnp.allclose(out, ref, atol=1e-6, rtol=1e-6)

    # Path 2: tiled lane-dense "parallel" path, forced small tile for coverage.
    out_t = channel_scale_mul(x84, x79, tile_hw=256)
    jax.block_until_ready(out_t)
    assert jnp.allclose(out_t, ref, atol=1e-6, rtol=1e-6)

    # Path 3: mixed dtypes (bf16 activation, f32 scale) -> cast happens inside
    # the kernel; no wrapper-side converted copy, no aliasing (dtype differs).
    x79_bf = jax.random.normal(k3, (1, 144, 28, 28), dtype=jnp.bfloat16)
    ref_bf = x84 * x79_bf
    out_bf = channel_scale_mul(x84, x79_bf)
    jax.block_until_ready(out_bf)
    assert out_bf.dtype == ref_bf.dtype
    assert jnp.allclose(out_bf, ref_bf, atol=1e-5, rtol=1e-5)

    # Path 4: medium activation -> automatic tiled path with >=2 parallel blocks.
    x_med = jax.random.normal(k4, (2, 192, 48, 48), dtype=jnp.float32)
    s_med = jax.random.normal(k2, (1, 192, 1, 1), dtype=jnp.float32)
    ref_med = s_med * x_med
    out_med = channel_scale_mul(s_med, x_med)
    jax.block_until_ready(out_med)
    assert jnp.allclose(out_med, ref_med, atol=1e-6, rtol=1e-6)

    print("KERNEL_OK")
</pallas_src>

<mosaic_0001>
module attributes {stable_mosaic.version = 11 : i64} {
  func.func @_scale_mul_kernel(%arg0: memref<144x1xf32, #tpu.memory_space<vmem>>, %arg1: memref<144x784xf32, #tpu.memory_space<vmem>>, %arg2: memref<144x784xf32, #tpu.memory_space<vmem>>) attributes {dimension_semantics = [], scalar_prefetch = 0 : i64, scratch_operands = 0 : i64, tpu.core_type = #tpu.core_type<tc>} {
    %c0 = arith.constant 0 : index
    %c0_0 = arith.constant 0 : index
    %0 = vector.load %arg1[%c0, %c0_0] : memref<144x784xf32, #tpu.memory_space<vmem>>, vector<144x784xf32>
    %c0_1 = arith.constant 0 : index
    %c0_2 = arith.constant 0 : index
    %1 = vector.load %arg0[%c0_1, %c0_2] : memref<144x1xf32, #tpu.memory_space<vmem>>, vector<144x1xf32>
    %2 = vector.broadcast %1 : vector<144x1xf32> to vector<144x784xf32>
    %3 = arith.mulf %0, %2 : vector<144x784xf32>
    %c0_3 = arith.constant 0 : index
    %c0_4 = arith.constant 0 : index
    %4 = vector.load %arg2[%c0_3, %c0_4] : memref<144x784xf32, #tpu.memory_space<vmem>>, vector<144x784xf32>
    tpu.vector_store %arg2[%c0_3, %c0_4], %3 {strides = array<i32>} : memref<144x784xf32, #tpu.memory_space<vmem>>, vector<144x784xf32>,
    return
  }
}

</mosaic_0001>

<bundles_post_ra>
// kernel: tpu_custom_call.1
= control target key start
LH: loop header
LB: loop body
LE: loop exit
PB: predicated region body
PF: predicated region fallthrough
CT: control target
= control target key end

     0   :  { %7 = vsyncpa [#allocation3], 0  ;;  %s707_s0 = inlined_call_operand.vmem [shape: f32[144,1], index: 0, kind: input, shape index: {}]   ;;  %s708_s1 = inlined_call_operand.hbm [shape: f32[144,784], index: 1, kind: input, shape index: {}, may-alias: {1,2}]   ;;  %s709_s2 = inlined_call_operand.hbm [shape: f32[144,784], index: 2, kind: output, shape index: {}, may-alias: {1,2}]  }
   0x1   :  { %8 = vsyncpa [#allocation4], 0  ;;  %s585_s9 = smov [#allocation2]   ;;  %s537_s13 = scalar_lea.hbm %s708_s1, 16128 }
   0x2   :  { %s16_s10 = sshll.u32 %s585_s9, 4  ;;  %p538_p0 = scmp.ne.s32.totalorder %s708_s1, %s537_s13  ;;  %s17_s10 = int_to_ptr.vmem [resolvable:$true] %s16_s10 }
   0x3   :  { %p541_p1 = scmp.lt.u32.totalorder %s537_s13, %s708_s1 }
   0x5   :  { %p543_p2 = pnand %p541_p1, %p538_p0 }
   0x7   :  { %546 = shalt.err (!%p543_p2)
}
   0x8   :  { %s547_s18 = scalar_lea.vmem %s17_s10, 16128  ;;  %p552_p4 = scmp.lt.s32.totalorder %s17_s10, %s17_s10 }
   0x9   :  { %p548_p3 = scmp.ne.s32.totalorder %s17_s10, %s547_s18  ;;  %p553_p5 = scmp.lt.s32.totalorder %s547_s18, %s547_s18 }
   0xb   :  { %p554_p6 = por %p553_p5, %p552_p4 }
   0xd   :  { %p555_p7 = pnand %p554_p6, %p548_p3 }
   0xf   :  { %558 = shalt.err (!%p555_p7)
}
  0x10   :  { %s586_s19 = smov 896   ;;  %s587_s20 = smov 56  }
  0x11   :  { %22 = dma.hbm_to_vmem [thread:$0]  %s708_s1, 16128, %s17_s10, [#allocation3], %s586_s19, %s586_s19, %s587_s20  }
  0x12   :  { %581 = dma.done.wait [#allocation3], 16128  }
  0x13   :  { %582 = vsyncadd [#allocation3], 4294951168  ;;  %v588_v0 = vmov 0   ;;  %v154_v1 = vld [vmem:[%s707_s0 + $0x10] sm:$0xff]  ;;  %v152_v2 = vld [vmem:[%s707_s0] sm:$0xff]  ;;  %vm392_vm0 = vcmask 130048  }
  0x14   :  { %536 = vset.pattern.permute.xlu1 %v588_v0  ;;  %535 = vset.pattern.permute.xlu0 %v588_v0  ;;  %v155_v3 = vld [vmem:[%s707_s0 + $0x18] sm:$0xff]  ;;  %v153_v4 = vld [vmem:[%s707_s0 + $0x8] sm:$0xff]  ;;  %v156_v6 = vld [vmem:[%s707_s0 + $0x20] sm:$0xff] }
  0x15   :  { %182 = vperm.xlu1 %536, %v154_v1   ;;  %172 = vperm.xlu0 %535, %v152_v2   ;;  %v157_v5 = vld [vmem:[%s707_s0 + $0x28] sm:$0xff]  ;;  %v159_v7 = vld [vmem:[%s707_s0 + $0x38] sm:$0xff]  ;;  %v158_v8 = vld [vmem:[%s707_s0 + $0x30] sm:$0xff] }
  0x16   :  { %v161_v9 = vld [vmem:[%s707_s0 + $0x48] sm:$0xff]  ;;  %v160_v10 = vld [vmem:[%s707_s0 + $0x40] sm:$0xff]  ;;  %v163_v11 = vld [vmem:[%s707_s0 + $0x58] sm:$0xff] }
  0x17   :  { %v162_v12 = vld [vmem:[%s707_s0 + $0x50] sm:$0xff]  ;;  %v165_v13 = vld [vmem:[%s707_s0 + $0x68] sm:$0xff]  ;;  %v164_v14 = vld [vmem:[%s707_s0 + $0x60] sm:$0xff] }
  0x18   :  { %v167_v15 = vld [vmem:[%s707_s0 + $0x78] sm:$0xff]  ;;  %v166_v16 = vld [vmem:[%s707_s0 + $0x70] sm:$0xff]  ;;  %v169_v17 = vld [vmem:[%s707_s0 + $0x88] sm:$0xff] }
  0x19   :  { %187 = vperm.xlu1 %536, %v155_v3   ;;  %177 = vperm.xlu0 %535, %v153_v4   ;;  %v168_v18 = vld [vmem:[%s707_s0 + $0x80] sm:$0xff]  ;;  %v40_v19 = vld [vmem:[#allocation2 + $0x70] sm:$0xff]  ;;  %v41_v20 = vld [vmem:[#allocation2 + $0x78] sm:$0xff]  ;;  %s589_s0 = smov [#allocation5]  }
  0x1a   :  { %v42_v21 = vld [vmem:[#allocation2 + $0x80] sm:$0xff]  ;;  %v43_v22 = vld [vmem:[#allocation2 + $0x88] sm:$0xff]  ;;  %v44_v23 = vld [vmem:[#allocation2 + $0x90] sm:$0xff]  ;;  %s518_s3 = sshll.u32 %s589_s0, 4  ;;  %s519_s3 = int_to_ptr.vmem [resolvable:$true] %s518_s3 }
  0x1b   :  { %v45_v24 = vld [vmem:[#allocation2 + $0x98] sm:$0xff]  ;;  %v46_v25 = vld [vmem:[#allocation2 + $0xa0] sm:$0xff]  ;;  %v27_v27 = vld [vmem:[#allocation2 + $0x8] sm:$0xff]  ;;  %s559_s4 = scalar_lea.vmem %s519_s3, 16128  ;;  %p564_p9 = scmp.lt.s32.totalorder %s519_s3, %s519_s3 }
  0x1c   :  { %v26_v26 = vld [vmem:[#allocation2] sm:$0xff]  ;;  %v28_v28 = vld [vmem:[#allocation2 + $0x10] sm:$0xff]  ;;  %v29_v29 = vld [vmem:[#allocation2 + $0x18] sm:$0xff]  ;;  %p560_p8 = scmp.ne.s32.totalorder %s519_s3, %s559_s4  ;;  %p565_p10 = scmp.lt.s32.totalorder %s559_s4, %s559_s4 }
  0x1d   :  { %197 = vperm.xlu1 %536, %v157_v5   ;;  %192 = vperm.xlu0 %535, %v156_v6   ;;  %v30_v30 = vld [vmem:[#allocation2 + $0x20] sm:$0xff]  ;;  %v31_v31 = vld [vmem:[#allocation2 + $0x28] sm:$0xff]  ;;  %v32_v32 = vld [vmem:[#allocation2 + $0x30] sm:$0xff] }
  0x1e   :  { %v47_v35 = vld [vmem:[#allocation2 + $0xa8] sm:$0xff]  ;;  %v48_v36 = vld [vmem:[#allocation2 + $0xb0] sm:$0xff]  ;;  %v49_v37 = vld [vmem:[#allocation2 + $0xb8] sm:$0xff]  ;;  %p566_p11 = por %p565_p10, %p564_p9 }
  0x1f   :  { %v50_v38 = vld [vmem:[#allocation2 + $0xc0] sm:$0xff]  ;;  %v51_v43 = vld [vmem:[#allocation2 + $0xc8] sm:$0xff]  ;;  %v52_v44 = vld [vmem:[#allocation2 + $0xd0] sm:$0xff] }
  0x20   :  { %v53_v45 = vld [vmem:[#allocation2 + $0xd8] sm:$0xff]  ;;  %v34_v51 = vld [vmem:[#allocation2 + $0x40] sm:$0xff]  ;;  %v35_v52 = vld [vmem:[#allocation2 + $0x48] sm:$0xff]  ;;  %p567_p12 = pnand %p566_p11, %p560_p8 }
  0x21   :  { %207 = vperm.xlu1 %536, %v159_v7   ;;  %202 = vperm.xlu0 %535, %v158_v8   ;;  %v33_v46 = vld [vmem:[#allocation2 + $0x38] sm:$0xff]  ;;  %v36_v53 = vld [vmem:[#allocation2 + $0x50] sm:$0xff]  ;;  %v38_v59 = vld [vmem:[#allocation2 + $0x60] sm:$0xff] }
  0x22   :  { %v37_v58 = vld [vmem:[#allocation2 + $0x58] sm:$0xff]  ;;  %v39_v60 = vld [vmem:[#allocation2 + $0x68] sm:$0xff]  ;;  %v62_v2 = vld [vmem:[#allocation2 + $0x120] sm:$0xff] }
  0x23   :  { %v61_v1 = vld [vmem:[#allocation2 + $0x118] sm:$0xff]  ;;  %v63_v3 = vld [vmem:[#allocation2 + $0x128] sm:$0xff]  ;;  %v64_v4 = vld [vmem:[#allocation2 + $0x130] sm:$0xff] }
  0x25   :  { %217 = vperm.xlu1 %536, %v161_v9   ;;  %212 = vperm.xlu0 %535, %v160_v10   ;;  %v65_v9 = vld [vmem:[#allocation2 + $0x138] sm:$0xff]  ;;  %v66_v10 = vld [vmem:[#allocation2 + $0x140] sm:$0xff] }
  0x29   :  { %227 = vperm.xlu1 %536, %v163_v11   ;;  %222 = vperm.xlu0 %535, %v162_v12   ;;  %v67_v11 = vld [vmem:[#allocation2 + $0x148] sm:$0xff]  ;;  %v54_v12 = vld [vmem:[#allocation2 + $0xe0] sm:$0xff] }
  0x2d   :  { %237 = vperm.xlu1 %536, %v165_v13   ;;  %232 = vperm.xlu0 %535, %v164_v14  }
  0x31   :  { %247 = vperm.xlu1 %536, %v167_v15   ;;  %242 = vperm.xlu0 %535, %v166_v16  }
  0x35   :  { %257 = vperm.xlu1 %536, %v169_v17   ;;  %252 = vperm.xlu0 %535, %v168_v18   ;;  %v55_v17 = vld [vmem:[#allocation2 + $0xe8] sm:$0xff]  ;;  %v56_v18 = vld [vmem:[#allocation2 + $0xf0] sm:$0xff] }
  0x94   :  { %v183_v33 = vpop.permute.xlu1 %182  ;;  %v173_v34 = vpop.permute.xlu0 %172 }
  0x95   :  { %v274_v39 = vmul.f32 %v183_v33, %v40_v19  ;;  %v275_v40 = vmul.f32 %v183_v33, %v41_v20  ;;  %v276_v41 = vmul.f32 %v183_v33, %v42_v21  ;;  %v277_v42 = vmul.f32 %v183_v33, %v43_v22  ;;  %v57_v19 = vld [vmem:[#allocation2 + $0xf8] sm:$0xff] }
  0x96   :  { %v278_v47 = vmul.f32 %v183_v33, %v44_v23  ;;  %v279_v48 = vmul.f32 %v183_v33, %v45_v24  ;;  %v280_v49 = vmul.f32 %v183_v33, %v46_v25  ;;  %v260_v50 = vmul.f32 %v173_v34, %v26_v26  ;;  %v58_v24 = vld [vmem:[#allocation2 + $0x100] sm:$0xff]  ;;  %v59_v25 = vld [vmem:[#allocation2 + $0x108] sm:$0xff]  ;;  %v60_v26 = vld [vmem:[#allocation2 + $0x110] sm:$0xff] }
  0x97   :  { %401 = vst [vmem:[#allocation5 + $0x70] sm:$0xff] %v274_v39  ;;  %402 = vst [vmem:[#allocation5 + $0x78] sm:$0xff] %v275_v40  ;;  %v261_v54 = vmul.f32 %v173_v34, %v27_v27  ;;  %v262_v55 = vmul.f32 %v173_v34, %v28_v28  ;;  %v263_v56 = vmul.f32 %v173_v34, %v29_v29  ;;  %v77_v33 = vld [vmem:[#allocation2 + $0x198] sm:$0xff]  ;;  %v79_v39 = vld [vmem:[#allocation2 + $0x1a8] sm:$0xff] }
  0x98   :  { %403 = vst [vmem:[#allocation5 + $0x80] sm:$0xff] %v276_v41  ;;  %404 = vst [vmem:[#allocation5 + $0x88] sm:$0xff] %v277_v42  ;;  %v264_v57 = vmul.f32 %v173_v34, %v30_v30  ;;  %v265_v61 = vmul.f32 %v173_v34, %v31_v31  ;;  %v266_v62 = vmul.f32 %v173_v34, %v32_v32  ;;  %v188_v63 = vpop.permute.xlu1 %187  ;;  %v178_v0 = vpop.permute.xlu0 %177  ;;  %v75_v31 = vld [vmem:[#allocation2 + $0x188] sm:$0xff]  ;;  %v76_v32 = vld [vmem:[#allocation2 + $0x190] sm:$0xff] }
  0x99   :  { %405 = vst [vmem:[#allocation5 + $0x90] sm:$0xff] %v278_v47  ;;  %406 = vst [vmem:[#allocation5 + $0x98] sm:$0xff] %v279_v48  ;;  %v281_v5 = vmul.f32 %v188_v63, %v47_v35  ;;  %v282_v6 = vmul.f32 %v188_v63, %v48_v36  ;;  %v283_v7 = vmul.f32 %v188_v63, %v49_v37  ;;  %v78_v34 = vld [vmem:[#allocation2 + $0x1a0] sm:$0xff]  ;;  %v80_v40 = vld [vmem:[#allocation2 + $0x1b0] sm:$0xff] }
  0x9a   :  { %407 = vst.msk [vmem:[#allocation5 + $0xa0] sm:$0xff] %vm392_vm0, %v280_v49  ;;  %386 = vst [vmem:[#allocation5] sm:$0xff] %v260_v50  ;;  %v284_v8 = vmul.f32 %v188_v63, %v50_v38  ;;  %v285_v13 = vmul.f32 %v188_v63, %v51_v43  ;;  %v286_v14 = vmul.f32 %v188_v63, %v52_v44  ;;  %v81_v41 = vld [vmem:[#allocation2 + $0x1b8] sm:$0xff]  ;;  %v68_v42 = vld [vmem:[#allocation2 + $0x150] sm:$0xff] }
  0x9b   :  { %387 = vst [vmem:[#allocation5 + $0x8] sm:$0xff] %v261_v54  ;;  %388 = vst [vmem:[#allocation5 + $0x10] sm:$0xff] %v262_v55  ;;  %v287_v15 = vmul.f32 %v188_v63, %v53_v45  ;;  %v267_v16 = vmul.f32 %v178_v0, %v33_v46  ;;  %v268_v20 = vmul.f32 %v178_v0, %v34_v51  ;;  %v69_v47 = vld [vmem:[#allocation2 + $0x158] sm:$0xff]  ;;  %v70_v48 = vld [vmem:[#allocation2 + $0x160] sm:$0xff] }
  0x9c   :  { %389 = vst [vmem:[#allocation5 + $0x18] sm:$0xff] %v263_v56  ;;  %390 = vst [vmem:[#allocation5 + $0x20] sm:$0xff] %v264_v57  ;;  %v269_v21 = vmul.f32 %v178_v0, %v35_v52  ;;  %v270_v22 = vmul.f32 %v178_v0, %v36_v53  ;;  %v271_v23 = vmul.f32 %v178_v0, %v37_v58  ;;  %v198_v29 = vpop.permute.xlu1 %197  ;;  %v193_v30 = vpop.permute.xlu0 %192  ;;  %v71_v49 = vld [vmem:[#allocation2 + $0x168] sm:$0xff]  ;;  %v72_v54 = vld [vmem:[#allocation2 + $0x170] sm:$0xff] }
  0x9d   :  { %391 = vst [vmem:[#allocation5 + $0x28] sm:$0xff] %v265_v61  ;;  %393 = vst.msk [vmem:[#allocation5 + $0x30] sm:$0xff] %vm392_vm0, %v266_v62  ;;  %v272_v27 = vmul.f32 %v178_v0, %v38_v59  ;;  %v273_v28 = vmul.f32 %v178_v0, %v39_v60  ;;  %v295_v35 = vmul.f32 %v198_v29, %v61_v1  ;;  %v73_v55 = vld [vmem:[#allocation2 + $0x178] sm:$0xff]  ;;  %v74_v56 = vld [vmem:[#allocation2 + $0x180] sm:$0xff] }
  0x9e   :  { %408 = vst [vmem:[#allocation5 + $0xa8] sm:$0xff] %v281_v5  ;;  %409 = vst [vmem:[#allocation5 + $0xb0] sm:$0xff] %v282_v6  ;;  %v296_v36 = vmul.f32 %v198_v29, %v62_v2  ;;  %v297_v37 = vmul.f32 %v198_v29, %v63_v3  ;;  %v298_v38 = vmul.f32 %v198_v29, %v64_v4  ;;  %v89_v61 = vld [vmem:[#allocation2 + $0x1f8] sm:$0xff]  ;;  %v90_v62 = vld [vmem:[#allocation2 + $0x200] sm:$0xff] }
  0x9f   :  { %410 = vst [vmem:[#allocation5 + $0xb8] sm:$0xff] %v283_v7  ;;  %411 = vst [vmem:[#allocation5 + $0xc0] sm:$0xff] %v284_v8  ;;  %v299_v43 = vmul.f32 %v198_v29, %v65_v9  ;;  %v300_v44 = vmul.f32 %v198_v29, %v66_v10  ;;  %v301_v45 = vmul.f32 %v198_v29, %v67_v11  ;;  %v91_v63 = vld [vmem:[#allocation2 + $0x208] sm:$0xff]  ;;  %v92_v0 = vld [vmem:[#allocation2 + $0x210] sm:$0xff] }
  0xa0   :  { %412 = vst [vmem:[#allocation5 + $0xc8] sm:$0xff] %v285_v13  ;;  %413 = vst [vmem:[#allocation5 + $0xd0] sm:$0xff] %v286_v14  ;;  %v288_v46 = vmul.f32 %v193_v30, %v54_v12  ;;  %v289_v50 = vmul.f32 %v193_v30, %v55_v17  ;;  %v290_v51 = vmul.f32 %v193_v30, %v56_v18  ;;  %v208_v59 = vpop.permute.xlu1 %207  ;;  %v203_v60 = vpop.permute.xlu0 %202  ;;  %v93_v5 = vld [vmem:[#allocation2 + $0x218] sm:$0xff]  ;;  %v94_v6 = vld [vmem:[#allocation2 + $0x220] sm:$0xff] }
  0xa1   :  { %414 = vst.msk [vmem:[#allocation5 + $0xd8] sm:$0xff] %vm392_vm0, %v287_v15  ;;  %394 = vst [vmem:[#allocation5 + $0x38] sm:$0xff] %v267_v16  ;;  %v291_v52 = vmul.f32 %v193_v30, %v57_v19  ;;  %v292_v53 = vmul.f32 %v193_v30, %v58_v24  ;;  %v293_v57 = vmul.f32 %v193_v30, %v59_v25  ;;  %v95_v7 = vld [vmem:[#allocation2 + $0x228] sm:$0xff]  ;;  %v82_v8 = vld [vmem:[#allocation2 + $0x1c0] sm:$0xff] }
  0xa2   :  { %395 = vst [vmem:[#allocation5 + $0x40] sm:$0xff] %v268_v20  ;;  %396 = vst [vmem:[#allocation5 + $0x48] sm:$0xff] %v269_v21  ;;  %v294_v58 = vmul.f32 %v193_v30, %v60_v26  ;;  %v309_v1 = vmul.f32 %v208_v59, %v75_v31  ;;  %v310_v2 = vmul.f32 %v208_v59, %v76_v32  ;;  %v83_v13 = vld [vmem:[#allocation2 + $0x1c8] sm:$0xff]  ;;  %v84_v14 = vld [vmem:[#allocation2 + $0x1d0] sm:$0xff] }
  0xa3   :  { %397 = vst [vmem:[#allocation5 + $0x50] sm:$0xff] %v270_v22  ;;  %398 = vst [vmem:[#allocation5 + $0x58] sm:$0xff] %v271_v23  ;;  %v311_v3 = vmul.f32 %v208_v59, %v77_v33  ;;  %v312_v4 = vmul.f32 %v208_v59, %v78_v34  ;;  %v313_v9 = vmul.f32 %v208_v59, %v79_v39  ;;  %v85_v15 = vld [vmem:[#allocation2 + $0x1d8] sm:$0xff]  ;;  %v86_v20 = vld [vmem:[#allocation2 + $0x1e0] sm:$0xff] }
  0xa4   :  { %399 = vst [vmem:[#allocation5 + $0x60] sm:$0xff] %v272_v27  ;;  %400 = vst.msk [vmem:[#allocation5 + $0x68] sm:$0xff] %vm392_vm0, %v273_v28  ;;  %v314_v10 = vmul.f32 %v208_v59, %v80_v40  ;;  %v315_v11 = vmul.f32 %v208_v59, %v81_v41  ;;  %v302_v12 = vmul.f32 %v203_v60, %v68_v42  ;;  %v87_v21 = vld [vmem:[#allocation2 + $0x1e8] sm:$0xff]  ;;  %v88_v22 = vld [vmem:[#allocation2 + $0x1f0] sm:$0xff]  ;;  %v218_v25 = vpop.permute.xlu1 %217  ;;  %v213_v26 = vpop.permute.xlu0 %212 }
  0xa5   :  { %422 = vst [vmem:[#allocation5 + $0x118] sm:$0xff] %v295_v35  ;;  %423 = vst [vmem:[#allocation5 + $0x120] sm:$0xff] %v296_v36  ;;  %v303_v16 = vmul.f32 %v203_v60, %v69_v47  ;;  %v304_v17 = vmul.f32 %v203_v60, %v70_v48  ;;  %v305_v18 = vmul.f32 %v203_v60, %v71_v49  ;;  %v103_v27 = vld [vmem:[#allocation2 + $0x268] sm:$0xff]  ;;  %v104_v28 = vld [vmem:[#allocation2 + $0x270] sm:$0xff] }
  0xa6   :  { %424 = vst [vmem:[#allocation5 + $0x128] sm:$0xff] %v297_v37  ;;  %425 = vst [vmem:[#allocation5 + $0x130] sm:$0xff] %v298_v38  ;;  %v306_v19 = vmul.f32 %v203_v60, %v72_v54  ;;  %v307_v23 = vmul.f32 %v203_v60, %v73_v55  ;;  %v308_v24 = vmul.f32 %v203_v60, %v74_v56  ;;  %v105_v29 = vld [vmem:[#allocation2 + $0x278] sm:$0xff]  ;;  %v106_v30 = vld [vmem:[#allocation2 + $0x280] sm:$0xff] }
  0xa7   :  { %426 = vst [vmem:[#allocation5 + $0x138] sm:$0xff] %v299_v43  ;;  %427 = vst [vmem:[#allocation5 + $0x140] sm:$0xff] %v300_v44  ;;  %v323_v31 = vmul.f32 %v218_v25, %v89_v61  ;;  %v324_v32 = vmul.f32 %v218_v25, %v90_v62  ;;  %v325_v33 = vmul.f32 %v218_v25, %v91_v63  ;;  %v107_v35 = vld [vmem:[#allocation2 + $0x288] sm:$0xff]  ;;  %v108_v36 = vld [vmem:[#allocation2 + $0x290] sm:$0xff] }
  0xa8   :  { %428 = vst.msk [vmem:[#allocation5 + $0x148] sm:$0xff] %vm392_vm0, %v301_v45  ;;  %415 = vst [vmem:[#allocation5 + $0xe0] sm:$0xff] %v288_v46  ;;  %v326_v34 = vmul.f32 %v218_v25, %v92_v0  ;;  %v109_v37 = vld [vmem:[#allocation2 + $0x298] sm:$0xff]  ;;  %v96_v38 = vld [vmem:[#allocation2 + $0x230] sm:$0xff]  ;;  %v327_v39 = vmul.f32 %v218_v25, %v93_v5  ;;  %v328_v40 = vmul.f32 %v218_v25, %v94_v6  ;;  %v228_v55 = vpop.permute.xlu1 %227  ;;  %v223_v56 = vpop.permute.xlu0 %222 }
  0xa9   :  { %416 = vst [vmem:[#allocation5 + $0xe8] sm:$0xff] %v289_v50  ;;  %417 = vst [vmem:[#allocation5 + $0xf0] sm:$0xff] %v290_v51  ;;  %v329_v41 = vmul.f32 %v218_v25, %v95_v7  ;;  %v316_v42 = vmul.f32 %v213_v26, %v82_v8  ;;  %v97_v43 = vld [vmem:[#allocation2 + $0x238] sm:$0xff]  ;;  %v98_v44 = vld [vmem:[#allocation2 + $0x240] sm:$0xff]  ;;  %v317_v46 = vmul.f32 %v213_v26, %v83_v13 }
  0xaa   :  { %418 = vst [vmem:[#allocation5 + $0xf8] sm:$0xff] %v291_v52  ;;  %419 = vst [vmem:[#allocation5 + $0x100] sm:$0xff] %v292_v53  ;;  %v99_v45 = vld [vmem:[#allocation2 + $0x248] sm:$0xff]  ;;  %v318_v47 = vmul.f32 %v213_v26, %v84_v14  ;;  %v319_v48 = vmul.f32 %v213_v26, %v85_v15  ;;  %v320_v49 = vmul.f32 %v213_v26, %v86_v20  ;;  %v100_v50 = vld [vmem:[#allocation2 + $0x250] sm:$0xff] }
  0xab   :  { %420 = vst [vmem:[#allocation5 + $0x108] sm:$0xff] %v293_v57  ;;  %421 = vst.msk [vmem:[#allocation5 + $0x110] sm:$0xff] %vm392_vm0, %v294_v58  ;;  %v101_v51 = vld [vmem:[#allocation2 + $0x258] sm:$0xff]  ;;  %v102_v52 = vld [vmem:[#allocation2 + $0x260] sm:$0xff]  ;;  %v321_v53 = vmul.f32 %v213_v26, %v87_v21  ;;  %v322_v54 = vmul.f32 %v213_v26, %v88_v22  ;;  %v337_v61 = vmul.f32 %v228_v55, %v103_v27 }
  0xac   :  { %436 = vst [vmem:[#allocation5 + $0x188] sm:$0xff] %v309_v1  ;;  %437 = vst [vmem:[#allocation5 + $0x190] sm:$0xff] %v310_v2  ;;  %v117_v57 = vld [vmem:[#allocation2 + $0x2d8] sm:$0xff]  ;;  %v118_v58 = vld [vmem:[#allocation2 + $0x2e0] sm:$0xff]  ;;  %v338_v62 = vmul.f32 %v228_v55, %v104_v28  ;;  %v339_v63 = vmul.f32 %v228_v55, %v105_v29  ;;  %v340_v0 = vmul.f32 %v228_v55, %v106_v30  ;;  %v238_v20 = vpop.permute.xlu1 %237  ;;  %v233_v21 = vpop.permute.xlu0 %232 }
  0xad   :  { %438 = vst [vmem:[#allocation5 + $0x198] sm:$0xff] %v311_v3  ;;  %439 = vst [vmem:[#allocation5 + $0x1a0] sm:$0xff] %v312_v4  ;;  %v119_v59 = vld [vmem:[#allocation2 + $0x2e8] sm:$0xff]  ;;  %v120_v60 = vld [vmem:[#allocation2 + $0x2f0] sm:$0xff]  ;;  %v341_v4 = vmul.f32 %v228_v55, %v107_v35  ;;  %v342_v5 = vmul.f32 %v228_v55, %v108_v36  ;;  %v343_v6 = vmul.f32 %v228_v55, %v109_v37 }
  0xae   :  { %440 = vst [vmem:[#allocation5 + $0x1a8] sm:$0xff] %v313_v9  ;;  %441 = vst [vmem:[#allocation5 + $0x1b0] sm:$0xff] %v314_v10  ;;  %v121_v1 = vld [vmem:[#allocation2 + $0x2f8] sm:$0xff]  ;;  %v122_v2 = vld [vmem:[#allocation2 + $0x300] sm:$0xff]  ;;  %v330_v7 = vmul.f32 %v223_v56, %v96_v38  ;;  %v333_v13 = vmul.f32 %v223_v56, %v99_v45  ;;  %v334_v14 = vmul.f32 %v223_v56, %v100_v50 }
  0xaf   :  { %442 = vst.msk [vmem:[#allocation5 + $0x1b8] sm:$0xff] %vm392_vm0, %v315_v11  ;;  %429 = vst [vmem:[#allocation5 + $0x150] sm:$0xff] %v302_v12  ;;  %v123_v3 = vld [vmem:[#allocation2 + $0x308] sm:$0xff]  ;;  %v110_v8 = vld [vmem:[#allocation2 + $0x2a0] sm:$0xff]  ;;  %v331_v11 = vmul.f32 %v223_v56, %v97_v43  ;;  %v332_v12 = vmul.f32 %v223_v56, %v98_v44  ;;  %v351_v25 = vmul.f32 %v238_v20, %v117_v57 }
  0xb0   :  { %430 = vst [vmem:[#allocation5 + $0x158] sm:$0xff] %v303_v16  ;;  %431 = vst [vmem:[#allocation5 + $0x160] sm:$0xff] %v304_v17  ;;  %v111_v9 = vld [vmem:[#allocation2 + $0x2a8] sm:$0xff]  ;;  %v112_v10 = vld [vmem:[#allocation2 + $0x2b0] sm:$0xff]  ;;  %v352_v26 = vmul.f32 %v238_v20, %v118_v58  ;;  %v353_v27 = vmul.f32 %v238_v20, %v119_v59  ;;  %v354_v28 = vmul.f32 %v238_v20, %v120_v60 }
  0xb1   :  { %432 = vst [vmem:[#allocation5 + $0x168] sm:$0xff] %v305_v18  ;;  %433 = vst [vmem:[#allocation5 + $0x170] sm:$0xff] %v306_v19  ;;  %v113_v15 = vld [vmem:[#allocation2 + $0x2b8] sm:$0xff]  ;;  %v114_v16 = vld [vmem:[#allocation2 + $0x2c0] sm:$0xff]  ;;  %v335_v18 = vmul.f32 %v223_v56, %v101_v51  ;;  %v336_v19 = vmul.f32 %v223_v56, %v102_v52  ;;  %v344_v35 = vmul.f32 %v233_v21, %v110_v8 }
  0xb2   :  { %434 = vst [vmem:[#allocation5 + $0x178] sm:$0xff] %v307_v23  ;;  %435 = vst.msk [vmem:[#allocation5 + $0x180] sm:$0xff] %vm392_vm0, %v308_v24  ;;  %v115_v17 = vld [vmem:[#allocation2 + $0x2c8] sm:$0xff]  ;;  %v116_v22 = vld [vmem:[#allocation2 + $0x2d0] sm:$0xff] }
  0xb3   :  { %450 = vst [vmem:[#allocation5 + $0x1f8] sm:$0xff] %v323_v31  ;;  %451 = vst [vmem:[#allocation5 + $0x200] sm:$0xff] %v324_v32  ;;  %v131_v23 = vld [vmem:[#allocation2 + $0x348] sm:$0xff]  ;;  %v132_v24 = vld [vmem:[#allocation2 + $0x350] sm:$0xff]  ;;  %v355_v32 = vmul.f32 %v238_v20, %v121_v1 }
  0xb4   :  { %452 = vst [vmem:[#allocation5 + $0x208] sm:$0xff] %v325_v33  ;;  %453 = vst [vmem:[#allocation5 + $0x210] sm:$0xff] %v326_v34  ;;  %v133_v29 = vld [vmem:[#allocation2 + $0x358] sm:$0xff]  ;;  %v134_v30 = vld [vmem:[#allocation2 + $0x360] sm:$0xff]  ;;  %v356_v33 = vmul.f32 %v238_v20, %v122_v2  ;;  %v357_v34 = vmul.f32 %v238_v20, %v123_v3 }
  0xb5   :  { %454 = vst [vmem:[#allocation5 + $0x218] sm:$0xff] %v327_v39  ;;  %455 = vst [vmem:[#allocation5 + $0x220] sm:$0xff] %v328_v40  ;;  %v135_v31 = vld [vmem:[#allocation2 + $0x368] sm:$0xff]  ;;  %v136_v36 = vld [vmem:[#allocation2 + $0x370] sm:$0xff]  ;;  %v345_v39 = vmul.f32 %v233_v21, %v111_v9  ;;  %v346_v40 = vmul.f32 %v233_v21, %v112_v10 }
  0xb6   :  { %456 = vst.msk [vmem:[#allocation5 + $0x228] sm:$0xff] %vm392_vm0, %v329_v41  ;;  %443 = vst [vmem:[#allocation5 + $0x1c0] sm:$0xff] %v316_v42  ;;  %v137_v37 = vld [vmem:[#allocation2 + $0x378] sm:$0xff]  ;;  %v124_v38 = vld [vmem:[#allocation2 + $0x310] sm:$0xff]  ;;  %v347_v41 = vmul.f32 %v233_v21, %v113_v15  ;;  %v348_v42 = vmul.f32 %v233_v21, %v114_v16 }
  0xb7   :  { %444 = vst [vmem:[#allocation5 + $0x1c8] sm:$0xff] %v317_v46  ;;  %445 = vst [vmem:[#allocation5 + $0x1d0] sm:$0xff] %v318_v47  ;;  %v125_v43 = vld [vmem:[#allocation2 + $0x318] sm:$0xff]  ;;  %v126_v44 = vld [vmem:[#allocation2 + $0x320] sm:$0xff]  ;;  %v349_v46 = vmul.f32 %v233_v21, %v115_v17  ;;  %v350_v47 = vmul.f32 %v233_v21, %v116_v22 }
  0xb8   :  { %446 = vst [vmem:[#allocation5 + $0x1d8] sm:$0xff] %v319_v48  ;;  %447 = vst [vmem:[#allocation5 + $0x1e0] sm:$0xff] %v320_v49  ;;  %v127_v45 = vld [vmem:[#allocation2 + $0x328] sm:$0xff]  ;;  %v248_v48 = vpop.permute.xlu1 %247  ;;  %v243_v49 = vpop.permute.xlu0 %242  ;;  %v128_v50 = vld [vmem:[#allocation2 + $0x330] sm:$0xff] }
  0xb9   :  { %448 = vst [vmem:[#allocation5 + $0x1e8] sm:$0xff] %v321_v53  ;;  %449 = vst.msk [vmem:[#allocation5 + $0x1f0] sm:$0xff] %vm392_vm0, %v322_v54  ;;  %v129_v51 = vld [vmem:[#allocation2 + $0x338] sm:$0xff]  ;;  %v130_v52 = vld [vmem:[#allocation2 + $0x340] sm:$0xff]  ;;  %v365_v53 = vmul.f32 %v248_v48, %v131_v23  ;;  %v366_v54 = vmul.f32 %v248_v48, %v132_v24  ;;  %v367_v55 = vmul.f32 %v248_v48, %v133_v29 }
  0xba   :  { %464 = vst [vmem:[#allocation5 + $0x268] sm:$0xff] %v337_v61  ;;  %465 = vst [vmem:[#allocation5 + $0x270] sm:$0xff] %v338_v62  ;;  %v368_v56 = vmul.f32 %v248_v48, %v134_v30  ;;  %v145_v57 = vld [vmem:[#allocation2 + $0x3b8] sm:$0xff]  ;;  %v146_v58 = vld [vmem:[#allocation2 + $0x3c0] sm:$0xff]  ;;  %v369_v60 = vmul.f32 %v248_v48, %v135_v31  ;;  %v370_v61 = vmul.f32 %v248_v48, %v136_v36 }
  0xbb   :  { %466 = vst [vmem:[#allocation5 + $0x278] sm:$0xff] %v339_v63  ;;  %467 = vst [vmem:[#allocation5 + $0x280] sm:$0xff] %v340_v0  ;;  %v147_v59 = vld [vmem:[#allocation2 + $0x3c8] sm:$0xff]  ;;  %v371_v62 = vmul.f32 %v248_v48, %v137_v37  ;;  %v358_v63 = vmul.f32 %v243_v49, %v124_v38  ;;  %v148_v0 = vld [vmem:[#allocation2 + $0x3d0] sm:$0xff]  ;;  %v359_v3 = vmul.f32 %v243_v49, %v125_v43 }
  0xbc   :  { %468 = vst [vmem:[#allocation5 + $0x288] sm:$0xff] %v341_v4  ;;  %469 = vst [vmem:[#allocation5 + $0x290] sm:$0xff] %v342_v5  ;;  %v149_v1 = vld [vmem:[#allocation2 + $0x3d8] sm:$0xff]  ;;  %v150_v2 = vld [vmem:[#allocation2 + $0x3e0] sm:$0xff]  ;;  %v360_v4 = vmul.f32 %v243_v49, %v126_v44  ;;  %v361_v5 = vmul.f32 %v243_v49, %v127_v45  ;;  %v363_v10 = vmul.f32 %v243_v49, %v129_v51 }
  0xbd   :  { %470 = vst.msk [vmem:[#allocation5 + $0x298] sm:$0xff] %vm392_vm0, %v343_v6  ;;  %457 = vst [vmem:[#allocation5 + $0x230] sm:$0xff] %v330_v7  ;;  %v362_v6 = vmul.f32 %v243_v49, %v128_v50  ;;  %v151_v7 = vld [vmem:[#allocation2 + $0x3e8] sm:$0xff]  ;;  %v138_v8 = vld [vmem:[#allocation2 + $0x380] sm:$0xff] }
  0xbe   :  { %458 = vst [vmem:[#allocation5 + $0x238] sm:$0xff] %v331_v11  ;;  %459 = vst [vmem:[#allocation5 + $0x240] sm:$0xff] %v332_v12  ;;  %v139_v9 = vld [vmem:[#allocation2 + $0x388] sm:$0xff]  ;;  %v364_v11 = vmul.f32 %v243_v49, %v130_v52  ;;  %v258_v12 = vpop.permute.xlu1 %257  ;;  %v141_v15 = vld [vmem:[#allocation2 + $0x398] sm:$0xff] }
  0xbf   :  { %460 = vst [vmem:[#allocation5 + $0x248] sm:$0xff] %v333_v13  ;;  %461 = vst [vmem:[#allocation5 + $0x250] sm:$0xff] %v334_v14  ;;  %v253_v13 = vpop.permute.xlu0 %252  ;;  %v140_v14 = vld [vmem:[#allocation2 + $0x390] sm:$0xff]  ;;  %v142_v16 = vld [vmem:[#allocation2 + $0x3a0] sm:$0xff]  ;;  %v379_v17 = vmul.f32 %v258_v12, %v145_v57  ;;  %v382_v20 = vmul.f32 %v258_v12, %v148_v0  ;;  %v383_v23 = vmul.f32 %v258_v12, %v149_v1 }
  0xc0   :  { %462 = vst [vmem:[#allocation5 + $0x258] sm:$0xff] %v335_v18  ;;  %463 = vst.msk [vmem:[#allocation5 + $0x260] sm:$0xff] %vm392_vm0, %v336_v19  ;;  %v380_v18 = vmul.f32 %v258_v12, %v146_v58  ;;  %v381_v19 = vmul.f32 %v258_v12, %v147_v59  ;;  %v143_v21 = vld [vmem:[#allocation2 + $0x3a8] sm:$0xff]  ;;  %v144_v22 = vld [vmem:[#allocation2 + $0x3b0] sm:$0xff]  ;;  %v384_v24 = vmul.f32 %v258_v12, %v150_v2 }
  0xc1   :  { %478 = vst [vmem:[#allocation5 + $0x2d8] sm:$0xff] %v351_v25  ;;  %479 = vst [vmem:[#allocation5 + $0x2e0] sm:$0xff] %v352_v26  ;;  %v385_v25 = vmul.f32 %v258_v12, %v151_v7  ;;  %v372_v26 = vmul.f32 %v253_v13, %v138_v8  ;;  %v375_v29 = vmul.f32 %v253_v13, %v141_v15 }
  0xc2   :  { %480 = vst [vmem:[#allocation5 + $0x2e8] sm:$0xff] %v353_v27  ;;  %481 = vst [vmem:[#allocation5 + $0x2f0] sm:$0xff] %v354_v28  ;;  %v373_v27 = vmul.f32 %v253_v13, %v139_v9  ;;  %v374_v28 = vmul.f32 %v253_v13, %v140_v14  ;;  %v376_v30 = vmul.f32 %v253_v13, %v142_v16 }
  0xc3   :  { %482 = vst [vmem:[#allocation5 + $0x2f8] sm:$0xff] %v355_v32  ;;  %483 = vst [vmem:[#allocation5 + $0x300] sm:$0xff] %v356_v33  ;;  %v377_v31 = vmul.f32 %v253_v13, %v143_v21  ;;  %v378_v32 = vmul.f32 %v253_v13, %v144_v22 }
  0xc4   :  { %484 = vst.msk [vmem:[#allocation5 + $0x308] sm:$0xff] %vm392_vm0, %v357_v34  ;;  %471 = vst [vmem:[#allocation5 + $0x2a0] sm:$0xff] %v344_v35 }
  0xc5   :  { %472 = vst [vmem:[#allocation5 + $0x2a8] sm:$0xff] %v345_v39  ;;  %473 = vst [vmem:[#allocation5 + $0x2b0] sm:$0xff] %v346_v40 }
  0xc6   :  { %474 = vst [vmem:[#allocation5 + $0x2b8] sm:$0xff] %v347_v41  ;;  %475 = vst [vmem:[#allocation5 + $0x2c0] sm:$0xff] %v348_v42 }
  0xc7   :  { %476 = vst [vmem:[#allocation5 + $0x2c8] sm:$0xff] %v349_v46  ;;  %477 = vst.msk [vmem:[#allocation5 + $0x2d0] sm:$0xff] %vm392_vm0, %v350_v47 }
  0xc8   :  { %492 = vst [vmem:[#allocation5 + $0x348] sm:$0xff] %v365_v53  ;;  %493 = vst [vmem:[#allocation5 + $0x350] sm:$0xff] %v366_v54 }
  0xc9   :  { %494 = vst [vmem:[#allocation5 + $0x358] sm:$0xff] %v367_v55  ;;  %495 = vst [vmem:[#allocation5 + $0x360] sm:$0xff] %v368_v56 }
  0xca   :  { %496 = vst [vmem:[#allocation5 + $0x368] sm:$0xff] %v369_v60  ;;  %497 = vst [vmem:[#allocation5 + $0x370] sm:$0xff] %v370_v61 }
  0xcb   :  { %498 = vst.msk [vmem:[#allocation5 + $0x378] sm:$0xff] %vm392_vm0, %v371_v62  ;;  %485 = vst [vmem:[#allocation5 + $0x310] sm:$0xff] %v358_v63 }
  0xcc   :  { %486 = vst [vmem:[#allocation5 + $0x318] sm:$0xff] %v359_v3  ;;  %487 = vst [vmem:[#allocation5 + $0x320] sm:$0xff] %v360_v4 }
  0xcd   :  { %488 = vst [vmem:[#allocation5 + $0x328] sm:$0xff] %v361_v5  ;;  %489 = vst [vmem:[#allocation5 + $0x330] sm:$0xff] %v362_v6 }
  0xce   :  { %490 = vst [vmem:[#allocation5 + $0x338] sm:$0xff] %v363_v10  ;;  %491 = vst.msk [vmem:[#allocation5 + $0x340] sm:$0xff] %vm392_vm0, %v364_v11 }
  0xcf   :  { %506 = vst [vmem:[#allocation5 + $0x3b8] sm:$0xff] %v379_v17  ;;  %507 = vst [vmem:[#allocation5 + $0x3c0] sm:$0xff] %v380_v18 }
  0xd0   :  { %508 = vst [vmem:[#allocation5 + $0x3c8] sm:$0xff] %v381_v19  ;;  %509 = vst [vmem:[#allocation5 + $0x3d0] sm:$0xff] %v382_v20 }
  0xd1   :  { %510 = vst [vmem:[#allocation5 + $0x3d8] sm:$0xff] %v383_v23  ;;  %511 = vst [vmem:[#allocation5 + $0x3e0] sm:$0xff] %v384_v24 }
  0xd2   :  { %512 = vst.msk [vmem:[#allocation5 + $0x3e8] sm:$0xff] %vm392_vm0, %v385_v25  ;;  %499 = vst [vmem:[#allocation5 + $0x380] sm:$0xff] %v372_v26 }
  0xd3   :  { %500 = vst [vmem:[#allocation5 + $0x388] sm:$0xff] %v373_v27  ;;  %501 = vst [vmem:[#allocation5 + $0x390] sm:$0xff] %v374_v28 }
  0xd4   :  { %502 = vst [vmem:[#allocation5 + $0x398] sm:$0xff] %v375_v29  ;;  %503 = vst [vmem:[#allocation5 + $0x3a0] sm:$0xff] %v376_v30 }
  0xd5   :  { %504 = vst [vmem:[#allocation5 + $0x3a8] sm:$0xff] %v377_v31  ;;  %505 = vst.msk [vmem:[#allocation5 + $0x3b0] sm:$0xff] %vm392_vm0, %v378_v32 }
  0xd6   :  { %570 = shalt.err (!%p567_p12)
}
  0xd7   :  { %s571_s7 = scalar_lea.hbm %s709_s2, 16128 }
  0xd8   :  { %p572_p13 = scmp.ne.s32.totalorder %s709_s2, %s571_s7  ;;  %p575_p0 = scmp.lt.u32.totalorder %s571_s7, %s709_s2 }
  0xda   :  { %p577_p1 = pnand %p575_p0, %p572_p13 }
  0xdc   :  { %580 = shalt.err (!%p577_p1)
}
  0xdd   :  { %524 = dma.vmem_to_hbm [thread:$0]  %s519_s3, 16128, %s709_s2, [#allocation4], %s586_s19, %s586_s19, %s587_s20  }
  0xde   :  { %583 = dma.done.wait [#allocation4], 16128  }
  0xdf   :  { %584 = vsyncadd [#allocation4], 4294951168 }
  0xe0   :  { %528 = vsyncpa [#allocation3], 1 }
  0xe1   :  { %529 = vsyncpa [#allocation4], 1 }

</bundles_post_ra>
